<compile_context>
chip_gen: v7x
topology: tpu7x:2x2x1
jax: 0.10.0
libtpu: 0.0.40
codegen_flags: <defaults>
</compile_context>

<pallas_src>
import math

import jax
import jax.numpy as jnp
from jax.experimental import pallas as pl
from jax.experimental.pallas import tpu as pltpu


LANE = 128
SUBLANE = 8


def _round_up(a, m):
    return (a + m - 1) // m * m


def graph_conv_pool_kernel(a_ref, xk_ref, xr_ref, p_ref,
                           wroot_ref, wrel_ref, b_ref,
                           pp_ref, agg_ref):
    """grid = (node-row blocks ["parallel"], node-col blocks ["arbitrary"]).

    Accumulates agg = A_blk @ x in a VMEM scratch over the column axis; on the
    last column step runs GraphConv (two small MXU dots, no concat), tanh and
    the lane-dense partial pooled sum P_blk @ h for this row block.
    """
    k = pl.program_id(1)

    @pl.when(k == 0)
    def _():
        agg_ref[...] = jnp.zeros_like(agg_ref)

    # bf16 x bf16 -> f32 accumulation: no f32 re-materialization of the
    # (tile_n, tile_k) adjacency block; A values (0/1, small counts) are exact.
    agg_ref[...] += jnp.dot(a_ref[...], xk_ref[...],
                            preferred_element_type=jnp.float32)

    @pl.when(k == pl.num_programs(1) - 1)
    def _():
        # GraphConv (aggr="add"):  h = x W_root + (A x) W_rel + b ; dropout(p=0)=id
        h = jnp.tanh(
            jnp.dot(xr_ref[...], wroot_ref[...], preferred_element_type=jnp.float32)
            + jnp.dot(agg_ref[...], wrel_ref[...], preferred_element_type=jnp.float32)
            + b_ref[...])                                          # (tile_n, HP)
        # partial pooled sums for this row block: (G, tile_n) @ (tile_n, HP)
        pp_ref[0] = jnp.dot(p_ref[...], h, preferred_element_type=jnp.float32)


def pool_fc_kernel(pp_ref, invc_ref, wfc_ref, bfc_ref, out_ref):
    """Finish global_mean_pool (sum partials, scale by 1/count) + fc1 + tanh."""
    pooled = jnp.sum(pp_ref[...], axis=0) * invc_ref[...]          # (GP, HP)
    y = (jnp.dot(pooled, wfc_ref[...], preferred_element_type=jnp.float32)
         + bfc_ref[...])                                           # (GP, LP)
    out_ref[...] = jnp.tanh(y)                                     # dropout(p=0) = id


def _stage1_vmem_bytes(tile_n, tile_k, gp, hp, f):
    """Rough stage-1 VMEM footprint (double-buffered blocks + scratch + temps)."""
    lane_f = max(f, LANE)                       # feature dim lane-pads to 128
    a_blk = 2 * tile_n * tile_k * 2             # bf16 A block
    xk_blk = 2 * tile_k * lane_f * 2            # bf16 x column block
    xr_blk = 2 * tile_n * lane_f * 4            # f32 x row block
    p_blk = 2 * gp * tile_n * 4                 # f32 pooling block
    wts = 3 * 2 * SUBLANE * hp * 4              # W_root, W_rel, bias
    out = 2 * gp * hp * 4                       # partial-sum output block
    agg = tile_n * lane_f * 4                   # scratch accumulator
    temps = 2 * tile_n * hp * 4                 # h + temporaries headroom
    return a_blk + xk_blk + xr_blk + p_blk + wts + out + agg + temps


def mouse_graph_conv_net(x, edge_index, batch, params, num_graphs,
                         *, tile_n=None, tile_k=None):
    """x: [N, F] f32, edge_index: [2, E] i32, batch: [N] i32."""
    N, F = x.shape
    w_root, w_rel, b, wfc, bfc = params
    H = w_root.shape[1]
    L = wfc.shape[1]

    HP = _round_up(H, LANE)
    LP = _round_up(L, LANE)
    GP = _round_up(num_graphs, SUBLANE)

    # --- tile sizing against the real per-core VMEM (never request it all) ---
    try:
        vmem_cap = pltpu.get_tpu_info().vmem_capacity_bytes
    except Exception:  # pragma: no cover - conservative fallback = v7x per-TC size
        vmem_cap = 64 * 1024 * 1024
    budget = int(vmem_cap) * 3 // 4

    n_pad128 = _round_up(N, LANE)
    tn = _round_up(tile_n, LANE) if tile_n else 512        # 512 default (HBM-bound:
    tk = _round_up(tile_k, LANE) if tile_k else 512        #  big blocks amortize step overhead)
    tn = max(LANE, min(tn, n_pad128))
    tk = max(LANE, min(tk, n_pad128))
    while _stage1_vmem_bytes(tn, tk, GP, HP, F) > budget and (tn > LANE or tk > LANE):
        if tk >= tn and tk > LANE:
            tk = max(LANE, (tk // 2) // LANE * LANE)
        else:
            tn = max(LANE, (tn // 2) // LANE * LANE)

    NP = _round_up(N, (tn * tk) // math.gcd(tn, tk))
    nb, kb = NP // tn, NP // tk

    need = int(_stage1_vmem_bytes(tn, tk, GP, HP, F) * 1.25)
    cp_kwargs = dict(dimension_semantics=("parallel", "arbitrary"))
    if need > (32 << 20):                        # only override the default scoped limit
        cp_kwargs["vmem_limit_bytes"] = min(need, budget)
    compiler_params = pltpu.CompilerParams(**cp_kwargs)

    # --- glue (plain JAX): densify graph structure, pad to lane/sublane tiles ---
    src, dst = edge_index[0], edge_index[1]
    # A[dst, src] = edge multiplicity -> A @ x is PyG add-aggregation.
    # bf16 is exact for 0/1 and small multiplicities (<= 256).
    a = jnp.zeros((NP, NP), jnp.float32).at[dst, src].add(1.0).astype(jnp.bfloat16)
    # TODO(synk): for very large sparse E/N, replace the dense A operand with a
    # CSR/edge-list segment-sum driven by PrefetchScalarGridSpec scalar prefetch.
    # (int8 A would halve traffic again on v5e/v6e but is NOT valid on v7x's
    #  fp8-only MXU; bf16 is the portable baseline.)

    xk = jnp.zeros((NP, F), jnp.bfloat16).at[:N, :].set(x.astype(jnp.bfloat16))
    xr = jnp.zeros((NP, F), jnp.float32).at[:N, :].set(x)

    # lane-dense UN-normalized pooling matrix P: (GP, NP), blocked (GP, tile_n).
    batch_p = jnp.full((NP,), -1, jnp.int32).at[:N].set(batch)
    p = (jnp.arange(GP, dtype=jnp.int32)[:, None] == batch_p[None, :]).astype(jnp.float32)
    counts = jnp.sum(
        (jnp.arange(GP, dtype=jnp.int32)[:, None] == batch[None, :]).astype(jnp.float32),
        axis=1, keepdims=True)                                   # (GP, 1)
    inv_counts = 1.0 / jnp.maximum(counts, 1.0)

    # lane-padded weights (kept f32; K = F/H is tiny so the f32 MXU path is free)
    wroot_p = jnp.zeros((F, HP), jnp.float32).at[:, :H].set(w_root)
    wrel_p = jnp.zeros((F, HP), jnp.float32).at[:, :H].set(w_rel)
    b_p = jnp.zeros((1, HP), jnp.float32).at[0, :H].set(b)
    wfc_p = jnp.zeros((HP, LP), jnp.float32).at[:H, :L].set(wfc)
    bfc_p = jnp.zeros((1, LP), jnp.float32).at[0, :L].set(bfc)

    # --- stage 1: GraphConv + tanh + per-row-block pooled partial sums ---
    partial = pl.pallas_call(
        graph_conv_pool_kernel,
        out_shape=jax.ShapeDtypeStruct((nb, GP, HP), jnp.float32),
        grid_spec=pltpu.PrefetchScalarGridSpec(
            num_scalar_prefetch=0,
            grid=(nb, kb),
            in_specs=[
                pl.BlockSpec((tn, tk), lambda i, k: (i, k)),     # A block (bf16)
                pl.BlockSpec((tk, F), lambda i, k: (k, 0)),      # x column block (bf16)
                pl.BlockSpec((tn, F), lambda i, k: (i, 0)),      # x row block (f32)
                pl.BlockSpec((GP, tn), lambda i, k: (0, i)),     # pooling block (lane-dense)
                pl.BlockSpec((F, HP), lambda i, k: (0, 0)),      # W_root
                pl.BlockSpec((F, HP), lambda i, k: (0, 0)),      # W_rel
                pl.BlockSpec((1, HP), lambda i, k: (0, 0)),      # bias
            ],
            out_specs=pl.BlockSpec((1, GP, HP), lambda i, k: (i, 0, 0)),
            scratch_shapes=[pltpu.VMEM((tn, F), jnp.float32)],   # agg accumulator
        ),
        compiler_params=compiler_params,
    )(a, xk, xr, p, wroot_p, wrel_p, b_p)

    # --- stage 2: finish mean-pool + fc1 + tanh (tiny, lane-dense output) ---
    vmem = pl.BlockSpec(memory_space=pltpu.MemorySpace.VMEM)
    out_p = pl.pallas_call(
        pool_fc_kernel,
        out_shape=jax.ShapeDtypeStruct((GP, LP), jnp.float32),
        in_specs=[vmem] * 4,
        out_specs=vmem,
    )(partial, inv_counts, wfc_p, bfc_p)

    return out_p[:num_graphs, :L]


def reference_forward(x, edge_index, batch, params, num_graphs):
    """Pure-JAX f32 reference of the same forward for a correctness check."""
    w_root, w_rel, b, wfc, bfc = params
    N = x.shape[0]
    src, dst = edge_index[0], edge_index[1]
    A = jnp.zeros((N, N), jnp.float32).at[dst, src].add(1.0)
    h = jnp.tanh(x @ w_root + (A @ x) @ w_rel + b)
    onehot = (batch[None, :] == jnp.arange(num_graphs)[:, None]).astype(jnp.float32)
    pooled = (onehot @ h) / jnp.maximum(onehot.sum(axis=1, keepdims=True), 1.0)
    return jnp.tanh(pooled @ wfc + bfc)


if __name__ == "__main__":
    # small shapes consistent with the module's forward
    input_dim = 8
    hidden_size = 32
    n_latent_features = 16
    num_graphs = 2
    nodes_per_graph = 100                 # N = 200 -> with tile 128: grid (2, 2)
    num_nodes = num_graphs * nodes_per_graph

    key = jax.random.PRNGKey(0)
    kx, kr, kl, kf = jax.random.split(key, 4)

    # node features
    x = jax.random.normal(kx, (num_nodes, input_dim), dtype=jnp.float32)

    # ring edges within each graph (bidirectional), int32 edge_index [2, E]
    src_list, dst_list = [], []
    for g in range(num_graphs):
        base = g * nodes_per_graph
        for i in range(nodes_per_graph):
            a0 = base + i
            a1 = base + (i + 1) % nodes_per_graph
            src_list += [a0, a1]
            dst_list += [a1, a0]
    edge_index = jnp.array([src_list, dst_list], dtype=jnp.int32)

    # batch assignment: first 100 nodes -> graph 0, next 100 -> graph 1
    batch = jnp.repeat(jnp.arange(num_graphs, dtype=jnp.int32), nodes_per_graph)

    # deterministic parameter init (GraphConv: W_root [F,H], W_rel [F,H], bias [H];
    # fc1: W [H,L], bias [L])
    w_root = jax.random.normal(kr, (input_dim, hidden_size), jnp.float32) * 0.3
    w_rel = jax.random.normal(kl, (input_dim, hidden_size), jnp.float32) * 0.3
    b_gc = jnp.linspace(-0.1, 0.1, hidden_size, dtype=jnp.float32)
    w_fc = jax.random.normal(kf, (hidden_size, n_latent_features), jnp.float32) * 0.2
    b_fc = jnp.linspace(-0.05, 0.05, n_latent_features, dtype=jnp.float32)
    params = (w_root, w_rel, b_gc, w_fc, b_fc)

    # tile 128x128 -> 2x2 grid: exercises the parallel row axis and the
    # "arbitrary" column-accumulation axis.
    out = mouse_graph_conv_net(x, edge_index, batch, params, num_graphs,
                               tile_n=128, tile_k=128)
    out = jax.block_until_ready(out)

    ref = reference_forward(x, edge_index, batch, params, num_graphs)
    assert out.shape == (num_graphs, n_latent_features)
    # x is bf16 on the A@x path (f32 accumulation), so tolerance is bf16-level.
    assert jnp.allclose(out, ref, atol=1e-2, rtol=1e-2)

    print("KERNEL_OK")
</pallas_src>

<mosaic_0001>
module attributes {stable_mosaic.version = 11 : i64} {
  func.func @graph_conv_pool_kernel(%arg0: i32, %arg1: i32, %arg2: memref<128x128xbf16, #tpu.memory_space<vmem>>, %arg3: memref<128x8xbf16, #tpu.memory_space<vmem>>, %arg4: memref<128x8xf32, #tpu.memory_space<vmem>>, %arg5: memref<8x128xf32, #tpu.memory_space<vmem>>, %arg6: memref<8x128xf32, #tpu.memory_space<vmem>>, %arg7: memref<8x128xf32, #tpu.memory_space<vmem>>, %arg8: memref<1x128xf32, #tpu.memory_space<vmem>>, %arg9: memref<1x8x128xf32, #tpu.memory_space<vmem>>, %arg10: memref<128x8xf32, #tpu.memory_space<vmem>>) attributes {dimension_semantics = [#tpu.dimension_semantics<parallel>, #tpu.dimension_semantics<arbitrary>], iteration_bounds = array<i64: 2, 2>, scalar_prefetch = 0 : i64, scratch_operands = 1 : i64, tpu.core_type = #tpu.core_type<tc>, window_params = [{transform_indices = @transform_0, window_bounds = array<i64: 128, 128>}, {transform_indices = @transform_1, window_bounds = array<i64: 128, 8>}, {transform_indices = @transform_2, window_bounds = array<i64: 128, 8>}, {transform_indices = @transform_3, window_bounds = array<i64: 8, 128>}, {pipeline_mode = #tpu.pipeline_mode<synchronous>, transform_indices = @transform_4, window_bounds = array<i64: 8, 128>}, {pipeline_mode = #tpu.pipeline_mode<synchronous>, transform_indices = @transform_5, window_bounds = array<i64: 8, 128>}, {pipeline_mode = #tpu.pipeline_mode<synchronous>, transform_indices = @transform_6, window_bounds = array<i64: 1, 128>}, {transform_indices = @transform_7, window_bounds = array<i64: 1, 8, 128>}]} {
    %c0_i32 = arith.constant 0 : i32
    %0 = arith.cmpi eq, %arg1, %c0_i32 : i32
    %1 = arith.extui %0 : i1 to i32
    %c0_i32_0 = arith.constant 0 : i32
    %2 = arith.cmpi ne, %1, %c0_i32_0 : i32
    scf.if %2 {
      %cst_9 = arith.constant 0.000000e+00 : f32
      %12 = vector.broadcast %cst_9 : f32 to vector<128x8xf32>
      %c0_10 = arith.constant 0 : index
      %c0_11 = arith.constant 0 : index
      %13 = vector.load %arg10[%c0_10, %c0_11] : memref<128x8xf32, #tpu.memory_space<vmem>>, vector<128x8xf32>
      tpu.vector_store %arg10[%c0_10, %c0_11], %12 {strides = array<i32>} : memref<128x8xf32, #tpu.memory_space<vmem>>, vector<128x8xf32>,
    } else {
    }
    %c0 = arith.constant 0 : index
    %c0_1 = arith.constant 0 : index
    %3 = vector.load %arg10[%c0, %c0_1] : memref<128x8xf32, #tpu.memory_space<vmem>>, vector<128x8xf32>
    %c0_2 = arith.constant 0 : index
    %c0_3 = arith.constant 0 : index
    %4 = vector.load %arg2[%c0_2, %c0_3] : memref<128x128xbf16, #tpu.memory_space<vmem>>, vector<128x128xbf16>
    %c0_4 = arith.constant 0 : index
    %c0_5 = arith.constant 0 : index
    %5 = vector.load %arg3[%c0_4, %c0_5] : memref<128x8xbf16, #tpu.memory_space<vmem>>, vector<128x8xbf16>
    %cst = arith.constant dense<0.000000e+00> : vector<128x8xf32>
    %6 = tpu.matmul %4, %5, %cst {dimension_numbers = #tpu.dot_dimension_numbers<[1], [0], [0], [1], [0, 0, 1, 1], [], []>} : vector<128x128xbf16>, vector<128x8xbf16>, vector<128x8xf32> -> vector<128x8xf32>
    %7 = arith.addf %3, %6 : vector<128x8xf32>
    %c0_6 = arith.constant 0 : index
    %c0_7 = arith.constant 0 : index
    %8 = vector.load %arg10[%c0_6, %c0_7] : memref<128x8xf32, #tpu.memory_space<vmem>>, vector<128x8xf32>
    tpu.vector_store %arg10[%c0_6, %c0_7], %7 {strides = array<i32>} : memref<128x8xf32, #tpu.memory_space<vmem>>, vector<128x8xf32>,
    %c1_i32 = arith.constant 1 : i32
    %9 = arith.cmpi eq, %arg1, %c1_i32 : i32
    %10 = arith.extui %9 : i1 to i32
    %c0_i32_8 = arith.constant 0 : i32
    %11 = arith.cmpi ne, %10, %c0_i32_8 : i32
    scf.if %11 {
      %c0_9 = arith.constant 0 : index
      %c0_10 = arith.constant 0 : index
      %12 = vector.load %arg4[%c0_9, %c0_10] : memref<128x8xf32, #tpu.memory_space<vmem>>, vector<128x8xf32>
      %c0_11 = arith.constant 0 : index
      %c0_12 = arith.constant 0 : index
      %13 = vector.load %arg6[%c0_11, %c0_12] : memref<8x128xf32, #tpu.memory_space<vmem>>, vector<8x128xf32>
      %cst_13 = arith.constant dense<0.000000e+00> : vector<128x128xf32>
      %14 = tpu.matmul %12, %13, %cst_13 {dimension_numbers = #tpu.dot_dimension_numbers<[1], [0], [0], [1], [0, 0, 1, 1], [], []>} : vector<128x8xf32>, vector<8x128xf32>, vector<128x128xf32> -> vector<128x128xf32>
      %c0_14 = arith.constant 0 : index
      %c0_15 = arith.constant 0 : index
      %15 = vector.load %arg10[%c0_14, %c0_15] : memref<128x8xf32, #tpu.memory_space<vmem>>, vector<128x8xf32>
      %c0_16 = arith.constant 0 : index
      %c0_17 = arith.constant 0 : index
      %16 = vector.load %arg7[%c0_16, %c0_17] : memref<8x128xf32, #tpu.memory_space<vmem>>, vector<8x128xf32>
      %cst_18 = arith.constant dense<0.000000e+00> : vector<128x128xf32>
      %17 = tpu.matmul %15, %16, %cst_18 {dimension_numbers = #tpu.dot_dimension_numbers<[1], [0], [0], [1], [0, 0, 1, 1], [], []>} : vector<128x8xf32>, vector<8x128xf32>, vector<128x128xf32> -> vector<128x128xf32>
      %18 = arith.addf %14, %17 : vector<128x128xf32>
      %c0_19 = arith.constant 0 : index
      %c0_20 = arith.constant 0 : index
      %19 = vector.load %arg8[%c0_19, %c0_20] : memref<1x128xf32, #tpu.memory_space<vmem>>, vector<1x128xf32>
      %20 = vector.broadcast %19 : vector<1x128xf32> to vector<128x128xf32>
      %21 = arith.addf %18, %20 : vector<128x128xf32>
      %22 = math.tanh %21 : vector<128x128xf32>
      %c0_21 = arith.constant 0 : index
      %c0_22 = arith.constant 0 : index
      %23 = vector.load %arg5[%c0_21, %c0_22] : memref<8x128xf32, #tpu.memory_space<vmem>>, vector<8x128xf32>
      %cst_23 = arith.constant dense<0.000000e+00> : vector<8x128xf32>
      %24 = tpu.matmul %23, %22, %cst_23 {dimension_numbers = #tpu.dot_dimension_numbers<[1], [0], [0], [1], [0, 0, 1, 1], [], []>} : vector<8x128xf32>, vector<128x128xf32>, vector<8x128xf32> -> vector<8x128xf32>
      %c0_24 = arith.constant 0 : index
      %c0_25 = arith.constant 0 : index
      %c0_26 = arith.constant 0 : index
      %25 = vector.load %arg9[%c0_24, %c0_25, %c0_26] : memref<1x8x128xf32, #tpu.memory_space<vmem>>, vector<1x8x128xf32>
      %26 = vector.shape_cast %25 : vector<1x8x128xf32> to vector<8x128xf32>
      %27 = vector.shape_cast %24 : vector<8x128xf32> to vector<1x8x128xf32>
      tpu.vector_store %arg9[%c0_24, %c0_25, %c0_26], %27 {strides = array<i32>} : memref<1x8x128xf32, #tpu.memory_space<vmem>>, vector<1x8x128xf32>,
    } else {
    }
    return
  }
  func.func @transform_0(%arg0: i32, %arg1: i32) -> (i32, i32) {
    %c0_i32 = arith.constant 0 : i32
    return %arg0, %arg1 : i32, i32
  }
  func.func @transform_1(%arg0: i32, %arg1: i32) -> (i32, i32) {
    %c0_i32 = arith.constant 0 : i32
    %c0_i32_0 = arith.constant 0 : i32
    return %arg1, %c0_i32 : i32, i32
  }
  func.func @transform_2(%arg0: i32, %arg1: i32) -> (i32, i32) {
    %c0_i32 = arith.constant 0 : i32
    %c0_i32_0 = arith.constant 0 : i32
    return %arg0, %c0_i32 : i32, i32
  }
  func.func @transform_3(%arg0: i32, %arg1: i32) -> (i32, i32) {
    %c0_i32 = arith.constant 0 : i32
    %c0_i32_0 = arith.constant 0 : i32
    return %c0_i32, %arg0 : i32, i32
  }
  func.func @transform_4(%arg0: i32, %arg1: i32) -> (i32, i32) {
    %c0_i32 = arith.constant 0 : i32
    %c0_i32_0 = arith.constant 0 : i32
    %c0_i32_1 = arith.constant 0 : i32
    return %c0_i32, %c0_i32_0 : i32, i32
  }
  func.func @transform_5(%arg0: i32, %arg1: i32) -> (i32, i32) {
    %c0_i32 = arith.constant 0 : i32
    %c0_i32_0 = arith.constant 0 : i32
    %c0_i32_1 = arith.constant 0 : i32
    return %c0_i32, %c0_i32_0 : i32, i32
  }
  func.func @transform_6(%arg0: i32, %arg1: i32) -> (i32, i32) {
    %c0_i32 = arith.constant 0 : i32
    %c0_i32_0 = arith.constant 0 : i32
    %c0_i32_1 = arith.constant 0 : i32
    return %c0_i32, %c0_i32_0 : i32, i32
  }
  func.func @transform_7(%arg0: i32, %arg1: i32) -> (i32, i32, i32) {
    %c0_i32 = arith.constant 0 : i32
    %c0_i32_0 = arith.constant 0 : i32
    %c0_i32_1 = arith.constant 0 : i32
    return %arg0, %c0_i32, %c0_i32_0 : i32, i32, i32
  }
}

</mosaic_0001>

<bundles_post_ra>
// kernel: tpu_custom_call.1
= control target key start
LH: loop header
LB: loop body
LE: loop exit
PB: predicated region body
PF: predicated region fallthrough
CT: control target
= control target key end

     0   :  { %s2370_s0 = inlined_call_operand.vmem [shape: bf16[256,256], index: 0, kind: input, shape index: {}]   ;;  %s2371_s1 = inlined_call_operand.vmem [shape: bf16[256,8], index: 1, kind: input, shape index: {}]   ;;  %s2372_s2 = inlined_call_operand.vmem [shape: f32[256,8], index: 2, kind: input, shape index: {}]   ;;  %s2373_s3 = inlined_call_operand.vmem [shape: f32[8,256], index: 3, kind: input, shape index: {}]   ;;  %s2374_s4 = inlined_call_operand.vmem [shape: f32[8,128], index: 4, kind: input, shape index: {}]   ;;  %s2375_s5 = inlined_call_operand.vmem [shape: f32[8,128], index: 5, kind: input, shape index: {}]   ;;  %s2376_s6 = inlined_call_operand.vmem [shape: f32[1,128], index: 6, kind: input, shape index: {}]   ;;  %s2377_s7 = inlined_call_operand.hbm [shape: f32[2,8,128], index: 7, kind: output, shape index: {}]  }
   0x1   :  { %2386 = sst [smem:[#allocation16_spill]] %s2370_s0 }
   0x2   :  { %12 = vsyncpa [#allocation5], 0 }
   0x3   :  { %14 = vsyncpa [#allocation5 + $0x1], 0  ;;  %s2026_s24 = smov 0   ;;  %s2028_s25 = smov 0  }
   0x4   :  { %s2030_s26 = smov 0   ;;  %s2032_s27 = smov 0  }
   0x5   :  { %s2034_s28 = smov 0   ;;  %s2036_s29 = smov 0  }
   0x6   :  { %s2038_s30 = smov 0   ;;  %s2040_s8 = smov 0  }
   0x7   :  { %s2042_s9 = smov 0   ;;  %s2044_s10 = smov 0  }
   0x8 LB: > { %2387 = sst [smem:[#allocation7_spill]] %s1951_s26  ;;  %s1416_s11 = sadd.s32 4294967295, %s1979_s10   ;;  %s1979_s10 = sphi %s2044_s10, %s20_s10   ;;  %s1975_s9 = sphi %s2042_s9, %s2409_s9   ;;  %s1971_s8 = sphi %s2040_s8, %s2408_s8   ;;  %s1967_s30 = sphi %s2038_s30, %s2407_s30   ;;  %s1963_s29 = sphi %s2036_s29, %s2406_s29   ;;  %s1959_s28 = sphi %s2034_s28, %s2405_s28   ;;  %s1955_s27 = sphi %s2032_s27, %s2404_s27   ;;  %s1951_s26 = sphi %s2030_s26, %s2403_s26   ;;  %s1947_s25 = sphi %s2028_s25, %s2411_s25   ;;  %s1943_s24 = sphi %s2026_s24, %s2410_s24  }
   0x9   : > { %2388 = sst [smem:[#allocation8_spill]] %s1959_s28  ;;  %s1417_s12 = sadd.s32 4294967294, %s1979_s10  }
   0xa   : > { %2389 = sst [smem:[#allocation9_spill]] %s1971_s8  ;;  %s29_s13 = sadd.s32 1, %s1971_s8 }
   0xb   : > { %2390 = sst [smem:[#allocation10_spill]] %s1975_s9  ;;  %s32_s14 = sadd.s32 1, %s1975_s9 }
   0xc   : > { %p30_p0 = scmp.ge.s32.totalorder %s29_s13, 2  ;;  %s41_s15 = sadd.s32 1, %s1959_s28 }
   0xd   : > { %p48_p1 = scmp.ne.s32.totalorder %s1959_s28, %s1955_s27  ;;  %p49_p2 = scmp.eq.s32.totalorder %s1979_s10, 0 }
   0xe   : > { %s2413_s13 = smov (%p30_p0, %s29_s13), 0  ;;  %s2415_s14 = smov (!%p30_p0, %s32_s14), %s1975_s9 }
   0xf   : > { %2391 = sst [smem:[#allocation11_spill]] %s2413_s13  ;;  %s37_s16 = ssub.s32 %s1971_s8, %s2413_s13 }
  0x10   : > { %p2089_p3 = por %p49_p2, %p48_p1  ;;  %p34_p4 = scmp.ge.s32.totalorder %s2415_s14, 2 }
  0x11   : > { %s208_s18 = sadd.s32 1, %s1951_s26  ;;  %p218_p5 = scmp.ne.s32.totalorder %s1951_s26, %s1947_s25 }
  0x12   : > { %p219_p6 = scmp.eq.s32.totalorder %s1416_s11, 3  ;;  %s2417_s14 = smov (%p34_p4, %s2415_s14), 0 }
  0x13   : > { %2393 = sst [smem:[#allocation12_spill]] %s2417_s14  ;;  %p224_p8 = scmp.ne.s32.totalorder %s1947_s25, %s1943_s24 }
  0x14   : > { %p2098_p7 = por %p219_p6, %p218_p5  ;;  %s36_s20 = ssub.s32 %s1975_s9, %s2417_s14 }
  0x15   : > { %p225_p9 = scmp.eq.s32.totalorder %s1417_s12, 3  ;;  %s38_s21 = sor.u32 %s37_s16, %s36_s20 }
  0x16   : > { %p206_p10 = scmp.eq.s32.totalorder %s36_s20, 0  ;;  %p39_p11 = scmp.eq.s32.totalorder %s38_s21, 0 }
  0x17   : > { %p2106_p12 = por %p225_p9, %p224_p8  ;;  %p1419_p13 = scmp.ge.s32.totalorder %s1979_s10, 4 }
  0x18   : > { %s2111_s23 = scalar_select %p206_p10, %s1951_s26, %s208_s18  }
  0x19   : > { %s2395_s22 = scalar_select %p2106_p12, 1, 0 }
  0x1a   : > { %2397 = sst [smem:[#allocation14_spill]] %s2111_s23  ;;  %250 = sbr.rel (%p1419_p13) target bundleno = 53 (0x35), region = 28 }
  0x1b   : > { %2396 = sst [smem:[#allocation13_spill]] %s2395_s22 }
  0x1c   : > { %s2114_s11 = scalar_select %p39_p11, %s1959_s28, %s41_s15  }
  0x1e   : > { %2398 = sst [smem:[#allocation15_spill]] %s2114_s11 }
  0x21   : > { %253 = sbr.rel (!%p2089_p3) target bundleno = 53 (0x35), region = 32  ;;  %s255_s12 = sand.u32 (%p2089_p3), 1, %s1959_s28  }
  0x22   : > { %s1487_s16 = sshll.u32 (%p2089_p3), %s1975_s9, 5  ;;  %s1420_s20 = sshll.u32 (%p2089_p3), %s255_s12, 6 }
  0x23   : > { %s260_s21 = sadd.s32 (%p2089_p3), %s1971_s8, %s1487_s16  ;;  %s2399_s0 = sld [smem:[#allocation16_spill]] (%p2089_p3) }
  0x24   : > { %s1423_s14 = sshll.u32 (%p2089_p3), %s260_s21, 2  ;;  %s257_s15 = scalar_lea.vmem (%p2089_p3), [#allocation3], %s1420_s20 }
  0x29   : > { %s2125_s18 = scalar_lea.vmem %s2399_s0, %s1423_s14 }
  0x2a   : > { %v278_v0 = vld [vmem:[%s2125_s18] sm:$0xf]  ;;  %v280_v1 = vld [vmem:[%s2125_s18 + $0x8] sm:$0xf]  ;;  %v282_v2 = vld [vmem:[%s2125_s18 + $0x10] sm:$0xf] }
  0x2b   : > { %279 = vst [vmem:[%s257_s15] sm:$0xf] %v278_v0  ;;  %281 = vst [vmem:[%s257_s15 + $0x4] sm:$0xf] %v280_v1  ;;  %v284_v3 = vld [vmem:[%s2125_s18 + $0x18] sm:$0xf] }
  0x2c   : > { %283 = vst [vmem:[%s257_s15 + $0x8] sm:$0xf] %v282_v2  ;;  %v286_v4 = vld [vmem:[%s2125_s18 + $0x20] sm:$0xf]  ;;  %v288_v5 = vld [vmem:[%s2125_s18 + $0x28] sm:$0xf] }
  0x2d   : > { %285 = vst [vmem:[%s257_s15 + $0xc] sm:$0xf] %v284_v3  ;;  %287 = vst [vmem:[%s257_s15 + $0x10] sm:$0xf] %v286_v4  ;;  %v290_v6 = vld [vmem:[%s2125_s18 + $0x30] sm:$0xf] }
  0x2e   : > { %289 = vst [vmem:[%s257_s15 + $0x14] sm:$0xf] %v288_v5  ;;  %v292_v7 = vld [vmem:[%s2125_s18 + $0x38] sm:$0xf]  ;;  %v294_v8 = vld [vmem:[%s2125_s18 + $0x40] sm:$0xf] }
  0x2f   : > { %291 = vst [vmem:[%s257_s15 + $0x18] sm:$0xf] %v290_v6  ;;  %293 = vst [vmem:[%s257_s15 + $0x1c] sm:$0xf] %v292_v7  ;;  %v296_v9 = vld [vmem:[%s2125_s18 + $0x48] sm:$0xf] }
  0x30   : > { %295 = vst [vmem:[%s257_s15 + $0x20] sm:$0xf] %v294_v8  ;;  %v298_v10 = vld [vmem:[%s2125_s18 + $0x50] sm:$0xf]  ;;  %v300_v11 = vld [vmem:[%s2125_s18 + $0x58] sm:$0xf] }
  0x31   : > { %297 = vst [vmem:[%s257_s15 + $0x24] sm:$0xf] %v296_v9  ;;  %299 = vst [vmem:[%s257_s15 + $0x28] sm:$0xf] %v298_v10  ;;  %v302_v12 = vld [vmem:[%s2125_s18 + $0x60] sm:$0xf] }
  0x32   : > { %301 = vst [vmem:[%s257_s15 + $0x2c] sm:$0xf] %v300_v11  ;;  %v304_v13 = vld [vmem:[%s2125_s18 + $0x68] sm:$0xf]  ;;  %v306_v14 = vld [vmem:[%s2125_s18 + $0x70] sm:$0xf] }
  0x33   : > { %303 = vst [vmem:[%s257_s15 + $0x30] sm:$0xf] %v302_v12  ;;  %305 = vst [vmem:[%s257_s15 + $0x34] sm:$0xf] %v304_v13  ;;  %v308_v15 = vld [vmem:[%s2125_s18 + $0x78] sm:$0xf] }
  0x34   : > { %307 = vst [vmem:[%s257_s15 + $0x38] sm:$0xf] %v306_v14  ;;  %309 = vst [vmem:[%s257_s15 + $0x3c] sm:$0xf] %v308_v15 }
  0x35 PF: > { %p1424_p0 = scmp.ge.s32.totalorder %s1979_s10, 1  ;;  %p388_p1 = scmp.lt.s32.totalorder %s1979_s10, 5 }
  0x37   : > { %p389_p2 = pnand %p1424_p0, %p388_p1 }
  0x38   : > { %s395_s13 = sand.u32 (!%p389_p2), 1, %s1955_s27   ;;  %s2381_s14 = sand.u32 (!%p389_p2), 1, %s1947_s25  }
  0x39   : > { %392 = sbr.rel (%p389_p2) target bundleno = 832 (0x340), region = 85  ;;  %s1425_s17 = sshll.u32 (!%p389_p2), %s395_s13, 6 }
  0x3a   : > { %s2149_s22 = sshll.u32 (!%p389_p2), %s2381_s14, 3  ;;  %s1427_s12 = sshll.u32 (!%p389_p2), %s1963_s29, 4 }
  0x3b   : > { %s1429_s16 = sshll.u32 (!%p389_p2), %s1967_s30, 4  ;;  %p442_p3 = scmp.lt.s32.totalorder (!%p389_p2), %s1427_s12, 31 }
  0x3c   : > { %p448_p4 = scmp.lt.s32.totalorder (!%p389_p2), %s1429_s16, 31  ;;  %p453_p5 = scmp.lt.s32.totalorder (!%p389_p2), %s1967_s30, 1 }
  0x3d   : > { %s2170_s26 = scalar_lea.vmem (!%p389_p2), [#allocation3], %s1425_s17  ;;  %p1432_p6 = scmp.ne.s32.totalorder (!%p389_p2), %s1963_s29, 0 }
  0x40   : > { %s2419_s12 = smov (!%p442_p3, %s1427_s12), 31  ;;  %s2421_s16 = smov (!%p448_p4, %s1429_s16), 31 }
  0x41   : > { %s1428_s20 = sshll.u32 %s2419_s12, 2  ;;  %s1430_s27 = sshll.u32 %s2421_s16, 3  ;;  %vm462_vm0 = vcmask (!%p1432_p6), 64512   ;;  %v1981_v16 = vmov (!%p1432_p6), 0.0  }
  0x42   : > { %s2157_s15 = scalar_lea.vmem %s2371_s1, %s1428_s20  ;;  %s2162_s14 = scalar_lea.vmem %s2372_s2, %s1430_s27  ;;  %463 = vst.msk [vmem:[#allocation2] sm:$0xff] (!%p1432_p6), %vm462_vm0, %v1981_v16  ;;  %464 = vst.msk [vmem:[#allocation2 + $0x8] sm:$0xff] (!%p1432_p6), %vm462_vm0, %v1981_v16 }
  0x43   : > { %s454_s9 = scalar_select %p453_p5, %s1967_s30, 1 }
  0x44   : > { %s439_s12 = scalar_lea.vmem [#allocation4], %s2149_s22  ;;  %461 = sbr.rel (%p1432_p6) target bundleno = 75 (0x4b), region = 93  ;;  %465 = vst.msk [vmem:[#allocation2 + $0x10] sm:$0xff] (!%p1432_p6), %vm462_vm0, %v1981_v16  ;;  %466 = vst.msk [vmem:[#allocation2 + $0x18] sm:$0xff] (!%p1432_p6), %vm462_vm0, %v1981_v16 }
  0x45   : > { %s1431_s8 = sshll.u32 %s454_s9, 3  ;;  %467 = vst.msk [vmem:[#allocation2 + $0x20] sm:$0xff] (!%p1432_p6), %vm462_vm0, %v1981_v16  ;;  %468 = vst.msk [vmem:[#allocation2 + $0x28] sm:$0xff] (!%p1432_p6), %vm462_vm0, %v1981_v16 }
  0x46   : > { %s2168_s23 = scalar_lea.vmem %s2373_s3, %s1431_s8  ;;  %469 = vst.msk [vmem:[#allocation2 + $0x30] sm:$0xff] (!%p1432_p6), %vm462_vm0, %v1981_v16  ;;  %470 = vst.msk [vmem:[#allocation2 + $0x38] sm:$0xff] (!%p1432_p6), %vm462_vm0, %v1981_v16 }
  0x47   : > { %471 = vst.msk [vmem:[#allocation2 + $0x40] sm:$0xff] (!%p1432_p6), %vm462_vm0, %v1981_v16  ;;  %472 = vst.msk [vmem:[#allocation2 + $0x48] sm:$0xff] (!%p1432_p6), %vm462_vm0, %v1981_v16 }
  0x48   : > { %473 = vst.msk [vmem:[#allocation2 + $0x50] sm:$0xff] (!%p1432_p6), %vm462_vm0, %v1981_v16  ;;  %474 = vst.msk [vmem:[#allocation2 + $0x58] sm:$0xff] (!%p1432_p6), %vm462_vm0, %v1981_v16 }
  0x49   : > { %475 = vst.msk [vmem:[#allocation2 + $0x60] sm:$0xff] (!%p1432_p6), %vm462_vm0, %v1981_v16  ;;  %476 = vst.msk [vmem:[#allocation2 + $0x68] sm:$0xff] (!%p1432_p6), %vm462_vm0, %v1981_v16 }
  0x4a   : > { %477 = vst.msk [vmem:[#allocation2 + $0x70] sm:$0xff] (!%p1432_p6), %vm462_vm0, %v1981_v16  ;;  %478 = vst.msk [vmem:[#allocation2 + $0x78] sm:$0xff] (!%p1432_p6), %vm462_vm0, %v1981_v16 }
  0x4b PF: > { %v1821_v17 = vld [vmem:[%s2157_s15] sm:$0xff]   ;;  %v1822_v18 = vld [vmem:[%s2157_s15 + $0x8] sm:$0xff]   ;;  %v1823_v19 = vld [vmem:[%s2157_s15 + $0x10] sm:$0xff]   ;;  %vm736_vm1 = vcmask 64512   ;;  %p1449_p8 = scmp.ne.s32.totalorder %s1963_s29, 1 }
  0x4c   : > { %1555 = vmatprep.subr.bf16.mxu0 %v1821_v17  ;;  %1698 = vmatprep.subr.bf16.mxu1 %v1821_v17  ;;  %v1824_v20 = vld [vmem:[%s2157_s15 + $0x18] sm:$0xff]   ;;  %v1829_v21 = vld [vmem:[%s2170_s26] sm:$0xff]   ;;  %v1826_v24 = vld [vmem:[%s2157_s15 + $0x28] sm:$0xff]   ;;  %vm1983_vm2 = vmmov (!%p1449_p8), 0  }
  0x4d   : > { %1556 = vmatpush3.bf16.msra.mxu0 %v1821_v17  ;;  %1706 = vmatpush3.bf16.msra.mxu1 %v1821_v17  ;;  %v1830_v22 = vld [vmem:[%s2170_s26 + $0x20] sm:$0xff]   ;;  %v1827_v25 = vld [vmem:[%s2157_s15 + $0x30] sm:$0xff]   ;;  %v1828_v26 = vld [vmem:[%s2157_s15 + $0x38] sm:$0xff]  }
  0x4e   : > { %1557 = vmatprep.subr.bf16.mxu0 %v1822_v18  ;;  %1699 = vmatprep.subr.bf16.mxu1 %v1822_v18  ;;  %v1825_v23 = vld [vmem:[%s2157_s15 + $0x20] sm:$0xff]   ;;  %v1831_v27 = vld [vmem:[%s2170_s26 + $0x8] sm:$0xff]   ;;  %v1833_v29 = vld [vmem:[%s2170_s26 + $0x10] sm:$0xff]  }
  0x4f   : > { %1571 = vmatprep.mubr.bf16.mxu0 %v1829_v21  ;;  %1579 = vmatprep.mubr.bf16.mxu1 %v1830_v22  ;;  %v1832_v28 = vld [vmem:[%s2170_s26 + $0x28] sm:$0xff]   ;;  %v1834_v30 = vld [vmem:[%s2170_s26 + $0x30] sm:$0xff]   ;;  %v1835_v31 = vld [vmem:[%s2170_s26 + $0x18] sm:$0xff]  }
  0x50   : > { %v1836_v32 = vld [vmem:[%s2170_s26 + $0x38] sm:$0xff]   ;;  %v481_v33 = vld [vmem:[#allocation2 + $0x10] sm:$0xff]  ;;  %v479_v35 = vld [vmem:[#allocation2] sm:$0xff] }
  0x51   : > { %1558 = vmatpush3.bf16.msra.mxu0 %v1822_v18  ;;  %1707 = vmatpush3.bf16.msra.mxu1 %v1822_v18  ;;  %v489_v34 = vld [vmem:[#allocation2 + $0x50] sm:$0xff]  ;;  %v487_v36 = vld [vmem:[#allocation2 + $0x40] sm:$0xff]  ;;  %v482_v39 = vld [vmem:[#allocation2 + $0x18] sm:$0xff] }
  0x52   : > { %1559 = vmatprep.subr.bf16.mxu0 %v1823_v19  ;;  %1700 = vmatprep.subr.bf16.mxu1 %v1823_v19  ;;  %v490_v40 = vld [vmem:[#allocation2 + $0x58] sm:$0xff]  ;;  %v480_v45 = vld [vmem:[#allocation2 + $0x8] sm:$0xff]  ;;  %v485_v57 = vld [vmem:[#allocation2 + $0x30] sm:$0xff] }
  0x53   : > { %v488_v46 = vld [vmem:[#allocation2 + $0x48] sm:$0xff]  ;;  %v493_v58 = vld [vmem:[#allocation2 + $0x70] sm:$0xff]  ;;  %v483_v59 = vld [vmem:[#allocation2 + $0x20] sm:$0xff] }
  0x54   : > { %v491_v60 = vld [vmem:[#allocation2 + $0x60] sm:$0xff]  ;;  %v486_v63 = vld [vmem:[#allocation2 + $0x38] sm:$0xff]  ;;  %v484_v5 = vld [vmem:[#allocation2 + $0x28] sm:$0xff] }
  0x55   : > { %1560 = vmatpush3.bf16.msra.mxu0 %v1823_v19  ;;  %1708 = vmatpush3.bf16.msra.mxu1 %v1823_v19  ;;  %v494_v0 = vld [vmem:[#allocation2 + $0x78] sm:$0xff]  ;;  %v492_v6 = vld [vmem:[#allocation2 + $0x68] sm:$0xff]  ;;  %v790_v17 = vld [vmem:[%s2375_s5] sm:$0xff] (!%p1449_p8) }
  0x56   : > { %1561 = vmatprep.subr.bf16.mxu0 %v1824_v20  ;;  %1701 = vmatprep.subr.bf16.mxu1 %v1824_v20  ;;  %v773_v18 = vld [vmem:[%s2374_s4] sm:$0xff] (!%p1449_p8)  ;;  %v758_v22 = vld [vmem:[%s2162_s14 + $0x8] sm:$0xff] (!%p1449_p8) }
  0x59   : > { %1562 = vmatpush3.bf16.msra.mxu0 %v1824_v20  ;;  %1709 = vmatpush3.bf16.msra.mxu1 %v1824_v20  ;;  %v757_v20 = vld [vmem:[%s2162_s14] sm:$0xff] (!%p1449_p8) }
  0x5a   : > { %1563 = vmatprep.subr.bf16.mxu0 %v1825_v23  ;;  %1702 = vmatprep.subr.bf16.mxu1 %v1825_v23 }
  0x5d   : > { %1564 = vmatpush3.bf16.msra.mxu0 %v1825_v23  ;;  %1710 = vmatpush3.bf16.msra.mxu1 %v1825_v23 }
  0x5e   : > { %1565 = vmatprep.subr.bf16.mxu0 %v1826_v24  ;;  %1703 = vmatprep.subr.bf16.mxu1 %v1826_v24 }
  0x61   : > { %1566 = vmatpush3.bf16.msra.mxu0 %v1826_v24  ;;  %1711 = vmatpush3.bf16.msra.mxu1 %v1826_v24  ;;  %v759_v24 = vld [vmem:[%s2162_s14 + $0x10] sm:$0xff] (!%p1449_p8) }
  0x62   : > { %1567 = vmatprep.subr.bf16.mxu0 %v1827_v25  ;;  %1704 = vmatprep.subr.bf16.mxu1 %v1827_v25 }
  0x65   : > { %1568 = vmatpush3.bf16.msra.mxu0 %v1827_v25  ;;  %1712 = vmatpush3.bf16.msra.mxu1 %v1827_v25 }
  0x66   : > { %1569 = vmatprep.subr.bf16.mxu0 %v1828_v26  ;;  %1705 = vmatprep.subr.bf16.mxu1 %v1828_v26 }
  0x69   : > { %1570 = vmatpush3.bf16.msra.mxu0 %v1828_v26  ;;  %1713 = vmatpush3.bf16.msra.mxu1 %v1828_v26  ;;  %v760_v26 = vld [vmem:[%s2162_s14 + $0x18] sm:$0xff] (!%p1449_p8) }
  0x6a   : > { %1587 = vmatprep.subr.mxu1 (!%p1449_p8), %v790_v17  ;;  %1613 = vmatprep.subr.mxu0 (!%p1449_p8), %v773_v18 }
  0x6c   : > { %1572 = vmatmul.mubr.bf16.vlgmr.msra.gmra.mrb[0].mxu0 %v1831_v27  ;;  %1580 = vmatmul.mubr.bf16.vlgmr.msra.gmra.mrb[0].mxu1 %v1832_v28  ;;  %v761_v28 = vld [vmem:[%s2162_s14 + $0x20] sm:$0xff] (!%p1449_p8) }
  0x6d   : > { %1575 = vmatprep.mubr.bf16.mxu0 %v1833_v29  ;;  %1583 = vmatprep.mubr.bf16.mxu1 %v1834_v30  ;;  %v762_v30 = vld [vmem:[%s2162_s14 + $0x28] sm:$0xff] (!%p1449_p8) }
  0x6e   : > { %1588 = vmatpush3.msra.mxu1 (!%p1449_p8), %v790_v17  ;;  %1614 = vmatpush3.msra.mxu0 (!%p1449_p8), %v773_v18 }
  0x74   : > { %1576 = vmatmul.mubr.bf16.gmra.mrb[4].mxu0 %v1835_v31  ;;  %1584 = vmatmul.mubr.bf16.gmra.mrb[4].mxu1 %v1836_v32  ;;  %v763_v32 = vld [vmem:[%s2162_s14 + $0x30] sm:$0xff] (!%p1449_p8) }
  0x75   : > { %1615 = vmatprep.mubr.msk.f32.mxu0 (!%p1449_p8), %vm736_vm1, %v757_v20 }
 0x13f   : > { %v1573_v37 = vpop.f32.mrb[0].mxu0  ;;  %v1581_v38 = vpop.f32.mrb[0].mxu1 }
 0x140   : > { %v722_v41 = vadd.f32 %v1573_v37, %v481_v33  ;;  %v730_v42 = vadd.f32 %v1581_v38, %v489_v34  ;;  %v657_v43 = vpop.f32.mrb[1].mxu0  ;;  %v689_v44 = vpop.f32.mrb[1].mxu1  ;;  %1616 = vmatmul.mubr.msk.f32.vlgmr.msra.gmra.mrb[0].mxu0 (!%p1449_p8), %vm736_vm1, %v758_v22  ;;  %v764_v34 = vld [vmem:[%s2162_s14 + $0x38] sm:$0xff] (!%p1449_p8)  ;;  %v766_v38 = vld [vmem:[%s2162_s14 + $0x48] sm:$0xff] (!%p1449_p8) }
 0x141   : > { %v720_v47 = vadd.f32 %v657_v43, %v479_v35  ;;  %v728_v48 = vadd.f32 %v689_v44, %v487_v36  ;;  %v1574_v49 = vpop.f32.mrb[2].mxu0  ;;  %v1582_v50 = vpop.f32.mrb[2].mxu1  ;;  %1618 = vmatprep.mubr.msk.f32.mxu0 (!%p1449_p8), %vm736_vm1, %v759_v24  ;;  %v765_v36 = vld [vmem:[%s2162_s14 + $0x40] sm:$0xff] (!%p1449_p8) }
 0x142   : > { %739 = vst.msk [vmem:[#allocation2 + $0x10] sm:$0xff] %vm736_vm1, %v722_v41  ;;  %747 = vst.msk [vmem:[#allocation2 + $0x50] sm:$0xff] %vm736_vm1, %v730_v42  ;;  %v723_v51 = vadd.f32 %v1574_v49, %v482_v39  ;;  %v731_v52 = vadd.f32 %v1582_v50, %v490_v40  ;;  %v660_v53 = vpop.f32.mrb[3].mxu0  ;;  %v692_v54 = vpop.f32.mrb[3].mxu1  ;;  %v767_v40 = vld [vmem:[%s2162_s14 + $0x50] sm:$0xff] (!%p1449_p8)  ;;  %v768_v42 = vld [vmem:[%s2162_s14 + $0x58] sm:$0xff] (!%p1449_p8) }
 0x143   : > { %737 = vst.msk [vmem:[#allocation2] sm:$0xff] %vm736_vm1, %v720_v47  ;;  %745 = vst.msk [vmem:[#allocation2 + $0x40] sm:$0xff] %vm736_vm1, %v728_v48  ;;  %v721_v55 = vadd.f32 %v660_v53, %v480_v45  ;;  %v729_v56 = vadd.f32 %v692_v54, %v488_v46  ;;  %v769_v44 = vld [vmem:[%s2162_s14 + $0x60] sm:$0xff] (!%p1449_p8)  ;;  %v770_v46 = vld [vmem:[%s2162_s14 + $0x68] sm:$0xff] (!%p1449_p8) }
 0x144   : > { %740 = vst.msk [vmem:[#allocation2 + $0x18] sm:$0xff] %vm736_vm1, %v723_v51  ;;  %748 = vst.msk [vmem:[#allocation2 + $0x58] sm:$0xff] %vm736_vm1, %v731_v52  ;;  %1619 = vmatmul.mubr.msk.f32.gmra.mrb[2].mxu0 (!%p1449_p8), %vm736_vm1, %v760_v26  ;;  %v771_v48 = vld [vmem:[%s2162_s14 + $0x70] sm:$0xff] (!%p1449_p8)  ;;  %v772_v50 = vld [vmem:[%s2162_s14 + $0x78] sm:$0xff] (!%p1449_p8)  ;;  %v1982_v51 = vmov (!%p1449_p8), 0.0|0.0   ;;  %v1984_v52 = vmov (!%p1449_p8), 0.0  }
 0x145   : > { %738 = vst.msk [vmem:[#allocation2 + $0x8] sm:$0xff] %vm736_vm1, %v721_v55  ;;  %746 = vst.msk [vmem:[#allocation2 + $0x48] sm:$0xff] %vm736_vm1, %v729_v56  ;;  %1621 = vmatprep.mubr.msk.f32.mxu0 (!%p1449_p8), %vm736_vm1, %v761_v28  ;;  %1674 = vmatprep.subr.bf16.mxu1 (!%p1449_p8), %v1982_v51  ;;  %v2281_v55 = vld [vmem:[%s2376_s6] ss:$0 sm:$0xff] (!%p1449_p8) }
 0x147   : > { %v1577_v61 = vpop.f32.mrb[4].mxu0  ;;  %v1585_v62 = vpop.f32.mrb[4].mxu1  ;;  %756 = sbr.rel (%p1449_p8) target bundleno = 807 (0x327), region = 97 }
 0x148   : > { %v726_v1 = vadd.f32 %v1577_v61, %v485_v57  ;;  %v734_v2 = vadd.f32 %v1585_v62, %v493_v58  ;;  %v673_v3 = vpop.f32.mrb[5].mxu0  ;;  %v705_v4 = vpop.f32.mrb[5].mxu1  ;;  %1622 = vmatmul.mubr.msk.f32.gmra.mrb[4].mxu0 (!%p1449_p8), %vm736_vm1, %v762_v30 }
 0x149   : > { %v724_v7 = vadd.f32 %v673_v3, %v483_v59  ;;  %v732_v8 = vadd.f32 %v705_v4, %v491_v60  ;;  %v1578_v9 = vpop.f32.mrb[6].mxu0  ;;  %v1586_v10 = vpop.f32.mrb[6].mxu1  ;;  %v776_v23 = vld [vmem:[#allocation2 + $0x10] sm:$0xff] (!%p1449_p8)  ;;  %1624 = vmatprep.mubr.msk.f32.mxu0 (!%p1449_p8), %vm736_vm1, %v763_v32 }
 0x14a   : > { %743 = vst.msk [vmem:[#allocation2 + $0x30] sm:$0xff] %vm736_vm1, %v726_v1  ;;  %751 = vst.msk [vmem:[#allocation2 + $0x70] sm:$0xff] %vm736_vm1, %v734_v2  ;;  %v727_v11 = vadd.f32 %v1578_v9, %v486_v63  ;;  %v735_v12 = vadd.f32 %v1586_v10, %v494_v0  ;;  %v676_v13 = vpop.f32.mrb[7].mxu0  ;;  %v708_v14 = vpop.f32.mrb[7].mxu1  ;;  %v774_v19 = vld [vmem:[#allocation2] sm:$0xff] (!%p1449_p8)  ;;  %v784_v39 = vld [vmem:[#allocation2 + $0x50] sm:$0xff] (!%p1449_p8) }
 0x14b   : > { %741 = vst.msk [vmem:[#allocation2 + $0x20] sm:$0xff] %vm736_vm1, %v724_v7  ;;  %749 = vst.msk [vmem:[#allocation2 + $0x60] sm:$0xff] %vm736_vm1, %v732_v8  ;;  %v725_v15 = vadd.f32 %v676_v13, %v484_v5  ;;  %v733_v16 = vadd.f32 %v708_v14, %v492_v6  ;;  %1589 = vmatprep.mubr.msk.f32.mxu1 (!%p1449_p8), %vm736_vm1, %v774_v19  ;;  %v777_v25 = vld [vmem:[#allocation2 + $0x18] sm:$0xff] (!%p1449_p8)  ;;  %v782_v35 = vld [vmem:[#allocation2 + $0x40] sm:$0xff] (!%p1449_p8) }
 0x14c   : > { %744 = vst.msk [vmem:[#allocation2 + $0x38] sm:$0xff] %vm736_vm1, %v727_v11  ;;  %752 = vst.msk [vmem:[#allocation2 + $0x78] sm:$0xff] %vm736_vm1, %v735_v12  ;;  %v775_v21 = vld [vmem:[#allocation2 + $0x8] sm:$0xff] (!%p1449_p8)  ;;  %1625 = vmatmul.mubr.msk.f32.gmra.mrb[6].mxu0 (!%p1449_p8), %vm736_vm1, %v764_v34  ;;  %v785_v41 = vld [vmem:[#allocation2 + $0x58] sm:$0xff] (!%p1449_p8) }
 0x14d   : > { %742 = vst.msk [vmem:[#allocation2 + $0x28] sm:$0xff] %vm736_vm1, %v725_v15  ;;  %750 = vst.msk [vmem:[#allocation2 + $0x68] sm:$0xff] %vm736_vm1, %v733_v16  ;;  %1590 = vmatmul.mubr.msk.f32.vlgmr.msra.gmra.mrb[0].mxu1 (!%p1449_p8), %vm736_vm1, %v775_v21  ;;  %1627 = vmatprep.mubr.msk.f32.mxu0 (!%p1449_p8), %vm736_vm1, %v765_v36  ;;  %v783_v37 = vld [vmem:[#allocation2 + $0x48] sm:$0xff] (!%p1449_p8) }
 0x14e   : > { %1592 = vmatprep.mubr.msk.f32.mxu1 %vm736_vm1, %v776_v23 }
 0x150   : > { %1628 = vmatmul.mubr.msk.f32.gmra.mrb[8].mxu0 %vm736_vm1, %v766_v38 }
 0x151   : > { %1593 = vmatmul.mubr.msk.f32.gmra.mrb[2].mxu1 %vm736_vm1, %v777_v25  ;;  %v780_v31 = vld [vmem:[#allocation2 + $0x30] sm:$0xff]  ;;  %1630 = vmatprep.mubr.msk.f32.mxu0 %vm736_vm1, %v767_v40 }
 0x152   : > { %v778_v27 = vld [vmem:[#allocation2 + $0x20] sm:$0xff]  ;;  %v788_v47 = vld [vmem:[#allocation2 + $0x70] sm:$0xff] }
 0x153   : > { %1595 = vmatprep.mubr.msk.f32.mxu1 %vm736_vm1, %v778_v27  ;;  %v781_v33 = vld [vmem:[#allocation2 + $0x38] sm:$0xff]  ;;  %v786_v43 = vld [vmem:[#allocation2 + $0x60] sm:$0xff] }
 0x154   : > { %v779_v29 = vld [vmem:[#allocation2 + $0x28] sm:$0xff]  ;;  %1631 = vmatmul.mubr.msk.f32.gmra.mrb[10].mxu0 %vm736_vm1, %v768_v42  ;;  %v789_v49 = vld [vmem:[#allocation2 + $0x78] sm:$0xff] }
 0x155   : > { %1596 = vmatmul.mubr.msk.f32.gmra.mrb[4].mxu1 %vm736_vm1, %v779_v29  ;;  %1633 = vmatprep.mubr.msk.f32.mxu0 %vm736_vm1, %v769_v44  ;;  %v787_v45 = vld [vmem:[#allocation2 + $0x68] sm:$0xff] }
 0x156   : > { %1598 = vmatprep.mubr.msk.f32.mxu1 %vm736_vm1, %v780_v31 }
 0x158   : > { %1634 = vmatmul.mubr.msk.f32.gmra.mrb[12].mxu0 %vm736_vm1, %v770_v46 }
 0x159   : > { %1599 = vmatmul.mubr.msk.f32.gmra.mrb[6].mxu1 %vm736_vm1, %v781_v33  ;;  %1636 = vmatprep.mubr.msk.f32.mxu0 %vm736_vm1, %v771_v48 }
 0x15a   : > { %1601 = vmatprep.mubr.msk.f32.mxu1 %vm736_vm1, %v782_v35 }
 0x15c   : > { %1637 = vmatmul.mubr.msk.f32.gmra.mrb[14].mxu0 %vm736_vm1, %v772_v50 }
 0x15d   : > { %1602 = vmatmul.mubr.msk.f32.gmra.mrb[8].mxu1 %vm736_vm1, %v783_v37 }
 0x15e   : > { %1604 = vmatprep.mubr.msk.f32.mxu1 %vm736_vm1, %v784_v39 }
 0x161   : > { %1605 = vmatmul.mubr.msk.f32.gmra.mrb[10].mxu1 %vm736_vm1, %v785_v41 }
 0x162   : > { %1607 = vmatprep.mubr.msk.f32.mxu1 %vm736_vm1, %v786_v43 }
 0x165   : > { %1608 = vmatmul.mubr.msk.f32.gmra.mrb[12].mxu1 %vm736_vm1, %v787_v45 }
 0x166   : > { %1610 = vmatprep.mubr.msk.f32.mxu1 %vm736_vm1, %v788_v47 }
 0x169   : > { %1611 = vmatmul.mubr.msk.f32.gmra.mrb[14].mxu1 %vm736_vm1, %v789_v49 }
 0x16a   : > { %1671 = vmatprep.mubr.msk.f32.mxu1 %vm1983_vm2, %v1984_v52 }
 0x213   : > { %v1617_v54 = vpop.f32.mrb[0].mxu0 }
 0x214   : > { %v1098_v58 = vpop.f32.mrb[1].mxu0 }
 0x217   : > { %v1620_v63 = vpop.f32.mrb[2].mxu0 }
 0x218   : > { %v1108_v2 = vpop.f32.mrb[3].mxu0 }
 0x21b   : > { %v1623_v7 = vpop.f32.mrb[4].mxu0 }
 0x21c   : > { %v1118_v10 = vpop.f32.mrb[5].mxu0 }
 0x21f   : > { %v1626_v15 = vpop.f32.mrb[6].mxu0 }
 0x220   : > { %v1591_v53 = vpop.f32.mrb[0].mxu1  ;;  %v1128_v18 = vpop.f32.mrb[7].mxu0 }
 0x221   : > { %v1104_v56 = vadd.f32 %v1617_v54, %v1591_v53  ;;  %v905_v57 = vpop.f32.mrb[1].mxu1 }
 0x222   : > { %v1099_v59 = vadd.f32 %v1098_v58, %v905_v57 }
 0x223   : > { %v1185_v60 = vadd.f32 %v2281_v55, %v1104_v56  ;;  %v1629_v25 = vpop.f32.mrb[8].mxu0 }
 0x224   : > { %v1184_v61 = vadd.f32 %v2281_v55, %v1099_v59  ;;  %v1594_v62 = vpop.f32.mrb[2].mxu1  ;;  %v1138_v28 = vpop.f32.mrb[9].mxu0 }
 0x225   : > { %1837 = vtanh.f32 %v1185_v60  ;;  %v1114_v0 = vadd.f32 %v1620_v63, %v1594_v62  ;;  %v915_v1 = vpop.f32.mrb[3].mxu1 }
 0x226   : > { %1839 = vtanh.f32 %v1184_v61  ;;  %v1109_v3 = vadd.f32 %v1108_v2, %v915_v1 }
 0x227   : > { %v1187_v4 = vadd.f32 %v2281_v55, %v1114_v0  ;;  %v1632_v36 = vpop.f32.mrb[10].mxu0 }
 0x228   : > { %v1186_v5 = vadd.f32 %v2281_v55, %v1109_v3  ;;  %v1597_v6 = vpop.f32.mrb[4].mxu1  ;;  %v1148_v39 = vpop.f32.mrb[11].mxu0 }
 0x229   : > { %1841 = vtanh.f32 %v1187_v4  ;;  %v1124_v8 = vadd.f32 %v1623_v7, %v1597_v6  ;;  %v925_v9 = vpop.f32.mrb[5].mxu1 }
 0x22a   : > { %1843 = vtanh.f32 %v1186_v5  ;;  %v1119_v11 = vadd.f32 %v1118_v10, %v925_v9 }
 0x22b   : > { %v1189_v12 = vadd.f32 %v2281_v55, %v1124_v8  ;;  %v1635_v47 = vpop.f32.mrb[12].mxu0 }
 0x22c   : > { %v1188_v13 = vadd.f32 %v2281_v55, %v1119_v11  ;;  %v1600_v14 = vpop.f32.mrb[6].mxu1  ;;  %v1158_v50 = vpop.f32.mrb[13].mxu0 }
 0x22d   : > { %1845 = vtanh.f32 %v1189_v12  ;;  %v1134_v16 = vadd.f32 %v1626_v15, %v1600_v14  ;;  %v935_v17 = vpop.f32.mrb[7].mxu1  ;;  %v1216_v15 = vld [vmem:[%s2168_s23] sm:$0xff] }
 0x22e   : > { %1847 = vtanh.f32 %v1188_v13  ;;  %v1129_v19 = vadd.f32 %v1128_v18, %v935_v17 }
 0x22f   : > { %v1838_v20 = vpop.eup %1837  ;;  %v1191_v21 = vadd.f32 %v2281_v55, %v1134_v16  ;;  %v1638_v60 = vpop.f32.mrb[14].mxu0 }
 0x230   : > { %v1840_v22 = vpop.eup %1839  ;;  %v1190_v23 = vadd.f32 %v2281_v55, %v1129_v19  ;;  %v1603_v24 = vpop.f32.mrb[8].mxu1 }
 0x231   : > { %1849 = vtanh.f32 %v1191_v21  ;;  %v1144_v26 = vadd.f32 %v1629_v25, %v1603_v24  ;;  %v945_v27 = vpop.f32.mrb[9].mxu1  ;;  %v1675_v29 = vpack.c.bf16 %v1838_v20, %v1840_v22  ;;  %v1168_v63 = vpop.f32.mrb[15].mxu0 }
 0x232   : > { %1851 = vtanh.f32 %v1190_v23  ;;  %v1139_v30 = vadd.f32 %v1138_v28, %v945_v27 }
 0x233   : > { %v1842_v31 = vpop.eup %1841  ;;  %v1193_v32 = vadd.f32 %v2281_v55, %v1144_v26  ;;  %1676 = vmatpush3.bf16.msra.mxu1 %v1675_v29 }
 0x234   : > { %v1844_v33 = vpop.eup %1843  ;;  %v1192_v34 = vadd.f32 %v2281_v55, %v1139_v30  ;;  %v1606_v35 = vpop.f32.mrb[10].mxu1  ;;  %1677 = vmatprep.subr.bf16.mxu1 %v1982_v51 }
 0x235   : > { %1853 = vtanh.f32 %v1193_v32  ;;  %v1154_v37 = vadd.f32 %v1632_v36, %v1606_v35  ;;  %v955_v38 = vpop.f32.mrb[11].mxu1  ;;  %v1678_v40 = vpack.c.bf16 %v1842_v31, %v1844_v33 }
 0x236   : > { %1855 = vtanh.f32 %v1192_v34  ;;  %v1149_v41 = vadd.f32 %v1148_v39, %v955_v38 }
 0x237   : > { %v1846_v42 = vpop.eup %1845  ;;  %v1195_v43 = vadd.f32 %v2281_v55, %v1154_v37  ;;  %1679 = vmatpush3.bf16.msra.mxu1 %v1678_v40 }
 0x238   : > { %v1848_v44 = vpop.eup %1847  ;;  %v1194_v45 = vadd.f32 %v2281_v55, %v1149_v41  ;;  %v1609_v46 = vpop.f32.mrb[12].mxu1  ;;  %1680 = vmatprep.subr.bf16.mxu1 %v1982_v51 }
 0x239   : > { %1857 = vtanh.f32 %v1195_v43  ;;  %v1164_v48 = vadd.f32 %v1635_v47, %v1609_v46  ;;  %v965_v49 = vpop.f32.mrb[13].mxu1  ;;  %v1681_v52 = vpack.c.bf16 %v1846_v42, %v1848_v44 }
 0x23a   : > { %1859 = vtanh.f32 %v1194_v45  ;;  %v1159_v53 = vadd.f32 %v1158_v50, %v965_v49 }
 0x23b   : > { %v1850_v54 = vpop.eup %1849  ;;  %v1197_v56 = vadd.f32 %v2281_v55, %v1164_v48  ;;  %1682 = vmatpush3.bf16.msra.mxu1 %v1681_v52 }
 0x23c   : > { %v1852_v57 = vpop.eup %1851  ;;  %v1196_v58 = vadd.f32 %v2281_v55, %v1159_v53  ;;  %v1612_v59 = vpop.f32.mrb[14].mxu1  ;;  %1683 = vmatprep.subr.bf16.mxu1 %v1982_v51 }
 0x23d   : > { %1861 = vtanh.f32 %v1197_v56  ;;  %v1174_v61 = vadd.f32 %v1638_v60, %v1612_v59  ;;  %v975_v62 = vpop.f32.mrb[15].mxu1  ;;  %v1684_v0 = vpack.c.bf16 %v1850_v54, %v1852_v57 }
 0x23e   : > { %1863 = vtanh.f32 %v1196_v58  ;;  %v1169_v1 = vadd.f32 %v1168_v63, %v975_v62 }
 0x23f   : > { %v1854_v2 = vpop.eup %1853  ;;  %v1199_v3 = vadd.f32 %v2281_v55, %v1174_v61  ;;  %1685 = vmatpush3.bf16.msra.mxu1 %v1684_v0 }
 0x240   : > { %v1856_v4 = vpop.eup %1855  ;;  %v1198_v5 = vadd.f32 %v2281_v55, %v1169_v1  ;;  %1686 = vmatprep.subr.bf16.mxu1 %v1982_v51 }
 0x241   : > { %1865 = vtanh.f32 %v1199_v3  ;;  %v1687_v6 = vpack.c.bf16 %v1854_v2, %v1856_v4 }
 0x242   : > { %1867 = vtanh.f32 %v1198_v5 }
 0x243   : > { %v1858_v7 = vpop.eup %1857  ;;  %1688 = vmatpush3.bf16.msra.mxu1 %v1687_v6 }
 0x244   : > { %v1860_v8 = vpop.eup %1859  ;;  %1689 = vmatprep.subr.bf16.mxu1 %v1982_v51 }
 0x245   : > { %v1690_v9 = vpack.c.bf16 %v1858_v7, %v1860_v8 }
 0x247   : > { %v1862_v10 = vpop.eup %1861  ;;  %1691 = vmatpush3.bf16.msra.mxu1 %v1690_v9 }
 0x248   : > { %v1864_v11 = vpop.eup %1863  ;;  %1692 = vmatprep.subr.bf16.mxu1 %v1982_v51 }
 0x249   : > { %v1693_v12 = vpack.c.bf16 %v1862_v10, %v1864_v11 }
 0x24b   : > { %v1866_v55 = vpop.eup %1865  ;;  %1694 = vmatpush3.bf16.msra.mxu1 %v1693_v12 }
 0x24c   : > { %v1868_v13 = vpop.eup %1867  ;;  %1695 = vmatprep.subr.bf16.mxu1 %v1982_v51 }
 0x24d   : > { %v1696_v14 = vpack.c.bf16 %v1866_v55, %v1868_v13 }
 0x24f   : > { %1697 = vmatpush3.bf16.msra.mxu1 %v1696_v14 }
 0x252   : > { %1672 = vmatmul.mubr.f32.vlgmr.msra.gmra.mrb[16].mxu1 %v1216_v15 }
 0x325   : > { %v1283_v16 = vpop.f32.mrb[16].mxu1 }
 0x326   : > { %1287 = vst [vmem:[%s439_s12] sm:$0xff] %v1283_v16  ;;  %v1673_v17 = vpop.f32.mrb[17].mxu1 }
 0x327 PF: > { %s1484_s11 = sshll.u32 %s1967_s30, 7  ;;  %s1302_s20 = sshll.u32 %s439_s12, 4  ;;  %s1303_s20 = int_to_ptr.vmem [resolvable:$true] %s1302_s20 }
 0x328   : > { %s2313_s16 = scalar_lea.hbm %s2377_s7, %s1484_s11  ;;  %s2400_s23 = sand.u32 1, %s1947_s25  }
 0x329   : > { %s1289_s21 = scalar_lea.sflag [#allocation5], %s2400_s23  ;;  %s1869_s18 = scalar_lea.vmem %s1303_s20, 128 }
 0x32a   : > { %p1870_p9 = scmp.ne.s32.totalorder %s1303_s20, %s1869_s18  ;;  %s1985_s15 = smov [#allocation4]  }
 0x32b   : > { %s1873_s27 = sshll.u32 %s1985_s15, 4  ;;  %s1874_s27 = int_to_ptr.vmem [resolvable:$false] %s1873_s27 }
 0x32c   : > { %p1871_p10 = pnand %p1870_p9, %p2098_p7  ;;  %s1875_s13 = scalar_lea.vmem %s1874_s27, 256 }
 0x32d   : > { %p1876_p13 = scmp.lt.s32.totalorder %s1303_s20, %s1874_s27  ;;  %p1877_p0 = scmp.lt.s32.totalorder %s1875_s13, %s1869_s18 }
 0x32e   : > { %p1872_p11 = pneg %p1871_p10 }
 0x32f   : > { %p1878_p1 = por %p1877_p0, %p1876_p13 }
 0x331   : > { %p1879_p2 = pnand %p1878_p1, %p1872_p11 }
 0x333   : > { %1882 = shalt.err (!%p1879_p2)
}
 0x334   : > { %s1883_s30 = scalar_lea.hbm %s2313_s16, 128  ;;  %s1887_s0 = scalar_lea.hbm %s2377_s7, 256 }
 0x335   : > { %p1884_p3 = scmp.ne.s32.totalorder %s2313_s16, %s1883_s30  ;;  %p1888_p6 = scmp.lt.u32.totalorder %s2313_s16, %s2377_s7 }
 0x336   : > { %p1889_p8 = scmp.lt.u32.totalorder %s1887_s0, %s1883_s30  ;;  %p1891_p10 = scmp.lt.u32.totalorder %s1883_s30, %s2313_s16 }
 0x337   : > { %p1885_p4 = pnand %p1884_p3, %p2098_p7 }
 0x338   : > { %p1890_p9 = por %p1889_p8, %p1888_p6 }
 0x339   : > { %p1886_p5 = pneg %p1885_p4 }
 0x33a   : > { %p1892_p11 = por %p1891_p10, %p1890_p9 }
 0x33c   : > { %p1893_p13 = pnand %p1892_p11, %p1886_p5 }
 0x33e   : > { %1896 = shalt.err (!%p1893_p13)
}
 0x33f   : > { %1730 = dma.vmem_to_hbm [thread:$0]  (%p2098_p7), %s1303_s20, 128, %s2313_s16, %s1289_s21  }
 0x340 PF: > { %p1736_p0 = scmp.ge.s32.totalorder %s1979_s10, 2  ;;  %s1314_s29 = sand.u32 1, %s1943_s24  }
 0x341   : > { %s1315_s9 = scalar_lea.sflag [#allocation5], %s1314_s29 }
 0x342   : > { %p1733_p1 = pnand %p1736_p0, %p2106_p12 }
 0x344   : > { %1938 = dma.done.wait (!%p1733_p1), %s1315_s9, 128  }
 0x345   : > { %1940 = vsyncadd (!%p1733_p1), %s1315_s9, 4294967168  ;;  %s20_s10 = sadd.s32 1, %s1979_s10   ;;  %s2402_s11 = sld [smem:[#allocation7_spill]] }
 0x346   : > { %p17_p2 = scmp.ge.s32.totalorder %s20_s10, 6   ;;  %s2403_s26 = sld [smem:[#allocation14_spill]] }
 0x347   : > { %s2404_s27 = sld [smem:[#allocation8_spill]]  ;;  %s2405_s28 = sld [smem:[#allocation15_spill]] }
 0x348   : > { %s2406_s29 = sld [smem:[#allocation9_spill]]  ;;  %s2407_s30 = sld [smem:[#allocation10_spill]] }
 0x349   : > { %s2408_s8 = sld [smem:[#allocation11_spill]]  ;;  %s2409_s9 = sld [smem:[#allocation12_spill]] }
 0x34a   : > { %s2410_s24 = smov %s1947_s25  ;;  %19 = sbr.rel (!%p17_p2) target bundleno = 8 (0x8), region = 146 }
 0x34b   : > { %s2411_s25 = smov %s2402_s11 }
 0x351   :  { %1320 = vsyncpa [#allocation5], 1 }
 0x352   :  { %1322 = vsyncpa [#allocation5 + $0x1], 1 }

</bundles_post_ra>
